<compile_context>
chip_gen: v7x
topology: tpu7x:2x2x1
jax: 0.10.0
libtpu: 0.0.40
codegen_flags: <defaults>
</compile_context>

<pallas_src>
import functools

import jax
import jax.numpy as jnp
from jax.experimental import pallas as pl
from jax.experimental.pallas import tpu as pltpu


def _layernorm_kernel(x_ref, scale_ref, beta_ref, o_ref, *, eps, d):
    # x_ref: (TM, D) tile of rows; scale_ref / beta_ref: (1, D), VMEM-resident.
    x = x_ref[...].astype(jnp.float32)

    # Two-pass statistics in f32: mean, then centered sum of squares (stable).
    mean = jnp.sum(x, axis=-1, keepdims=True) * (1.0 / d)          # (TM, 1)
    xm = x - mean
    var = jnp.sum(xm * xm, axis=-1, keepdims=True) * (1.0 / max(d - 1, 1))
    std = jnp.sqrt(var)

    # One exact reciprocal per row (keeps the f32 1e-5 tolerance), then only
    # broadcast multiplies on the (TM, D) tile — no full-width divide.
    inv = pl.reciprocal(std + eps, approx=False)                   # (TM, 1)

    scale = scale_ref[...].astype(jnp.float32)
    beta = beta_ref[...].astype(jnp.float32)
    o_ref[...] = (xm * inv * scale + beta).astype(o_ref.dtype)


def _vmem_capacity_bytes():
    """Per-core VMEM capacity; conservative (v7x = 64 MiB/TC) if query fails."""
    try:
        return int(pltpu.get_tpu_info().vmem_capacity_bytes)
    except Exception:
        return 64 * 1024 * 1024


def _row_alignment(dtype):
    itemsize = jnp.dtype(dtype).itemsize
    if itemsize >= 4:
        return 8
    if itemsize == 2:
        return 16
    return 32


def _choose_block_rows(rows, d, dtype):
    """Pick a row-tile size aiming at ~4 MiB per (block_rows, d) tile, bounded by a
    generation-aware VMEM budget, dtype-aligned rows, and >= 4 grid blocks when the
    input is large enough (so v7x's two TensorCores both get work)."""
    itemsize = jnp.dtype(dtype).itemsize
    align = _row_alignment(dtype)

    # Budget: 2 double-buffered input tiles + 2 output tiles must fit comfortably
    # in VMEM (64 MiB/TC on v7x, 128 MiB on v5e/v6e); leave ~half free + margin.
    vmem = _vmem_capacity_bytes()
    per_tile_budget = max(256 * 1024, (vmem // 2 - 2 * 1024 * 1024) // 4)
    target_tile_bytes = min(4 * 1024 * 1024, per_tile_budget)

    br = target_tile_bytes // max(d * itemsize, 1)
    br = max(align, (br // align) * align)

    # Never exceed the (alignment-rounded) total row count.
    rows_al = ((rows + align - 1) // align) * align
    br = min(br, rows_al)

    # Ensure >= 4 grid blocks when there are enough rows (megacore split on v7x).
    min_blocks = 4
    if rows >= min_blocks * align:
        cap = ((rows + min_blocks - 1) // min_blocks // align) * align
        br = min(br, max(align, cap))

    return max(align, br)


def layer_norm(x, scale, beta, epsilon=1e-6, block_rows=None):
    """x: (..., d_model); scale, beta: (d_model,)"""
    orig_shape = x.shape
    d = orig_shape[-1]
    x2 = x.reshape(-1, d)
    rows = x2.shape[0]

    if block_rows is None:
        block_rows = _choose_block_rows(rows, d, x2.dtype)

    # Ragged last block handled by Pallas (masked partial writeback) — no padding.
    num_blocks = pl.cdiv(rows, block_rows)

    # VMEM limit from the real footprint: 2 double-buffered input tiles + 2 output
    # tiles + params + ~2 MiB margin; never above the physical per-core capacity.
    itemsize = jnp.dtype(x2.dtype).itemsize
    tile_bytes = block_rows * d * itemsize
    vmem_limit = 4 * tile_bytes + 4 * d * 4 + 2 * 1024 * 1024
    vmem_limit = int(min(max(vmem_limit, 4 * 1024 * 1024), _vmem_capacity_bytes()))

    scale2 = scale.reshape(1, d)
    beta2 = beta.reshape(1, d)

    kernel = functools.partial(_layernorm_kernel, eps=epsilon, d=d)

    out = pl.pallas_call(
        kernel,
        out_shape=jax.ShapeDtypeStruct((rows, d), x.dtype),
        grid=(num_blocks,),
        in_specs=[
            pl.BlockSpec((block_rows, d), lambda i: (i, 0)),
            pl.BlockSpec((1, d), lambda i: (0, 0)),
            pl.BlockSpec((1, d), lambda i: (0, 0)),
        ],
        out_specs=pl.BlockSpec((block_rows, d), lambda i: (i, 0)),
        compiler_params=pltpu.CompilerParams(
            dimension_semantics=("parallel",),
            vmem_limit_bytes=vmem_limit,
        ),
    )(x2, scale2, beta2)

    return out.reshape(orig_shape)


def _reference(x, scale, beta, eps):
    # Matches the custom PyTorch module: unbiased std (ddof=1), eps added to std.
    mean = jnp.mean(x, axis=-1, keepdims=True)
    std = jnp.std(x, axis=-1, keepdims=True, ddof=1)
    return scale * (x - mean) / (std + eps) + beta


if __name__ == "__main__":
    key = jax.random.PRNGKey(0)
    d_model = 128

    # Deterministic parameter init matching nn.Parameter(torch.ones/zeros(features)).
    scale = jnp.ones((d_model,), dtype=jnp.float32)
    beta = jnp.zeros((d_model,), dtype=jnp.float32)

    # Case 1: standard small shape (batch=2, seq=8, d_model=128).
    k1, k2 = jax.random.split(key)
    x1 = jax.random.normal(k1, (2, 8, d_model), dtype=jnp.float32) * 2.0 + 3.0
    y1 = layer_norm(x1, scale, beta, epsilon=1e-6)
    jax.block_until_ready(y1)
    assert jnp.allclose(y1, _reference(x1, scale, beta, 1e-6), atol=1e-5, rtol=1e-5), \
        "mismatch vs reference (case 1)"

    # Case 2: ragged row count (rows=15 with block_rows=8) to exercise the masked
    # partial last block (no padding path anymore).
    x2 = jax.random.normal(k2, (3, 5, d_model), dtype=jnp.float32)
    y2 = layer_norm(x2, scale, beta, epsilon=1e-6, block_rows=8)
    jax.block_until_ready(y2)
    assert jnp.allclose(y2, _reference(x2, scale, beta, 1e-6), atol=1e-5, rtol=1e-5), \
        "mismatch vs reference (case 2, ragged)"

    print("KERNEL_OK")
</pallas_src>

<mosaic_0001>
module attributes {stable_mosaic.version = 11 : i64} {
  func.func @_layernorm_kernel(%arg0: i32, %arg1: memref<16x128xf32, #tpu.memory_space<vmem>>, %arg2: memref<1x128xf32, #tpu.memory_space<vmem>>, %arg3: memref<1x128xf32, #tpu.memory_space<vmem>>, %arg4: memref<16x128xf32, #tpu.memory_space<vmem>>) attributes {dimension_semantics = [#tpu.dimension_semantics<parallel>], iteration_bounds = array<i64: 1>, scalar_prefetch = 0 : i64, scratch_operands = 0 : i64, tpu.core_type = #tpu.core_type<tc>, window_params = [{transform_indices = @transform_0, window_bounds = array<i64: 16, 128>}, {pipeline_mode = #tpu.pipeline_mode<synchronous>, transform_indices = @transform_1, window_bounds = array<i64: 1, 128>}, {pipeline_mode = #tpu.pipeline_mode<synchronous>, transform_indices = @transform_2, window_bounds = array<i64: 1, 128>}, {transform_indices = @transform_3, window_bounds = array<i64: 16, 128>}]} {
    %c0 = arith.constant 0 : index
    %c0_0 = arith.constant 0 : index
    %0 = vector.load %arg1[%c0, %c0_0] : memref<16x128xf32, #tpu.memory_space<vmem>>, vector<16x128xf32>
    %cst = arith.constant dense<0.000000e+00> : vector<16xf32>
    %1 = vector.multi_reduction <add>, %0, %cst [1] : vector<16x128xf32> to vector<16xf32>
    %2 = vector.shape_cast %1 : vector<16xf32> to vector<16x1xf32>
    %cst_1 = arith.constant 7.812500e-03 : f32
    %3 = vector.broadcast %cst_1 : f32 to vector<16x1xf32>
    %4 = arith.mulf %2, %3 : vector<16x1xf32>
    %5 = vector.broadcast %4 : vector<16x1xf32> to vector<16x128xf32>
    %6 = arith.subf %0, %5 : vector<16x128xf32>
    %7 = arith.mulf %6, %6 : vector<16x128xf32>
    %cst_2 = arith.constant dense<0.000000e+00> : vector<16xf32>
    %8 = vector.multi_reduction <add>, %7, %cst_2 [1] : vector<16x128xf32> to vector<16xf32>
    %9 = vector.shape_cast %8 : vector<16xf32> to vector<16x1xf32>
    %cst_3 = arith.constant 0.00787401571 : f32
    %10 = vector.broadcast %cst_3 : f32 to vector<16x1xf32>
    %11 = arith.mulf %9, %10 : vector<16x1xf32>
    %12 = math.sqrt %11 : vector<16x1xf32>
    %cst_4 = arith.constant 9.99999997E-7 : f32
    %13 = vector.broadcast %cst_4 : f32 to vector<16x1xf32>
    %14 = arith.addf %12, %13 : vector<16x1xf32>
    %15 = tpu.reciprocal %14 : vector<16x1xf32> -> vector<16x1xf32>
    %c0_5 = arith.constant 0 : index
    %c0_6 = arith.constant 0 : index
    %16 = vector.load %arg2[%c0_5, %c0_6] : memref<1x128xf32, #tpu.memory_space<vmem>>, vector<1x128xf32>
    %c0_7 = arith.constant 0 : index
    %c0_8 = arith.constant 0 : index
    %17 = vector.load %arg3[%c0_7, %c0_8] : memref<1x128xf32, #tpu.memory_space<vmem>>, vector<1x128xf32>
    %18 = vector.broadcast %15 : vector<16x1xf32> to vector<16x128xf32>
    %19 = arith.mulf %6, %18 : vector<16x128xf32>
    %20 = vector.broadcast %16 : vector<1x128xf32> to vector<16x128xf32>
    %21 = arith.mulf %19, %20 : vector<16x128xf32>
    %22 = vector.broadcast %17 : vector<1x128xf32> to vector<16x128xf32>
    %23 = arith.addf %21, %22 : vector<16x128xf32>
    %c0_9 = arith.constant 0 : index
    %c0_10 = arith.constant 0 : index
    %24 = vector.load %arg4[%c0_9, %c0_10] : memref<16x128xf32, #tpu.memory_space<vmem>>, vector<16x128xf32>
    tpu.vector_store %arg4[%c0_9, %c0_10], %23 {strides = array<i32>} : memref<16x128xf32, #tpu.memory_space<vmem>>, vector<16x128xf32>,
    return
  }
  func.func @transform_0(%arg0: i32) -> (i32, i32) {
    %c0_i32 = arith.constant 0 : i32
    %c0_i32_0 = arith.constant 0 : i32
    return %arg0, %c0_i32 : i32, i32
  }
  func.func @transform_1(%arg0: i32) -> (i32, i32) {
    %c0_i32 = arith.constant 0 : i32
    %c0_i32_0 = arith.constant 0 : i32
    %c0_i32_1 = arith.constant 0 : i32
    return %c0_i32, %c0_i32_0 : i32, i32
  }
  func.func @transform_2(%arg0: i32) -> (i32, i32) {
    %c0_i32 = arith.constant 0 : i32
    %c0_i32_0 = arith.constant 0 : i32
    %c0_i32_1 = arith.constant 0 : i32
    return %c0_i32, %c0_i32_0 : i32, i32
  }
  func.func @transform_3(%arg0: i32) -> (i32, i32) {
    %c0_i32 = arith.constant 0 : i32
    %c0_i32_0 = arith.constant 0 : i32
    return %arg0, %c0_i32 : i32, i32
  }
}

</mosaic_0001>

<bundles_post_ra>
// kernel: tpu_custom_call.1
= control target key start
LH: loop header
LB: loop body
LE: loop exit
PB: predicated region body
PF: predicated region fallthrough
CT: control target
= control target key end

     0   :  { %8 = vsyncpa [#allocation3], 0  ;;  %s226_s0 = inlined_call_operand.hbm [shape: f32[16,128], index: 0, kind: input, shape index: {}]   ;;  %s227_s1 = inlined_call_operand.vmem [shape: f32[1,128], index: 1, kind: input, shape index: {}]   ;;  %s228_s2 = inlined_call_operand.vmem [shape: f32[1,128], index: 2, kind: input, shape index: {}]   ;;  %s229_s3 = inlined_call_operand.hbm [shape: f32[16,128], index: 3, kind: output, shape index: {}]  }
   0x1   :  { %9 = vsyncpa [#allocation4], 0  ;;  %s166_s12 = smov [#allocation2]   ;;  %s118_s16 = scalar_lea.hbm %s226_s0, 256 }
   0x2   :  { %s15_s13 = sshll.u32 %s166_s12, 4  ;;  %p119_p0 = scmp.ne.s32.totalorder %s226_s0, %s118_s16  ;;  %s16_s13 = int_to_ptr.vmem [resolvable:$true] %s15_s13 }
   0x3   :  { %p122_p1 = scmp.lt.u32.totalorder %s118_s16, %s226_s0 }
   0x5   :  { %p124_p2 = pnand %p122_p1, %p119_p0 }
   0x7   :  { %127 = shalt.err (!%p124_p2)
}
   0x8   :  { %s128_s21 = scalar_lea.vmem %s16_s13, 256  ;;  %p133_p4 = scmp.lt.s32.totalorder %s16_s13, %s16_s13 }
   0x9   :  { %p129_p3 = scmp.ne.s32.totalorder %s16_s13, %s128_s21  ;;  %p134_p5 = scmp.lt.s32.totalorder %s128_s21, %s128_s21 }
   0xb   :  { %p135_p6 = por %p134_p5, %p133_p4 }
   0xd   :  { %p136_p7 = pnand %p135_p6, %p129_p3 }
   0xf   :  { %139 = shalt.err (!%p136_p7)
}
  0x10   :  { %s167_s22 = smov 128   ;;  %s168_s23 = smov 8  }
  0x11   :  { %21 = dma.hbm_to_vmem [thread:$0]  %s226_s0, 256, %s16_s13, [#allocation3], %s167_s22, %s167_s22, %s168_s23  }
  0x12   :  { %162 = dma.done.wait [#allocation3], 256  }
  0x13   :  { %163 = vsyncadd [#allocation3], 4294967040  ;;  %v29_v0 = vld [vmem:[#allocation2] sm:$0xff]  ;;  %v30_v1 = vld [vmem:[#allocation2 + $0x8] sm:$0xff]  ;;  %s169_s29 = smov [#allocation5]  }
  0x14   :  { %31 = vadd.xlane.f32.xlu0 %v29_v0  ;;  %v104_v27 = vld [vmem:[%s227_s1] ss:$0 sm:$0xff]  ;;  %s92_s30 = sshll.u32 %s169_s29, 4  ;;  %s93_s30 = int_to_ptr.vmem [resolvable:$true] %s92_s30 }
  0x15   :  { %v105_v29 = vld [vmem:[%s228_s2] ss:$0 sm:$0xff]  ;;  %s140_s4 = scalar_lea.vmem %s93_s30, 256  ;;  %p145_p9 = scmp.lt.s32.totalorder %s93_s30, %s93_s30 }
  0x16   :  { %p141_p8 = scmp.ne.s32.totalorder %s93_s30, %s140_s4  ;;  %p146_p10 = scmp.lt.s32.totalorder %s140_s4, %s140_s4 }
  0x18   :  { %33 = vadd.xlane.f32.xlu0 %v30_v1  ;;  %p147_p11 = por %p146_p10, %p145_p9 }
  0x1a   :  { %p148_p12 = pnand %p147_p11, %p141_p8 }
  0xa1   :  { %v32_v2 = vpop.xlane.xlu0 %31 }
  0xa2   :  { %v35_v3 = vmul.f32 0.0078125, %v32_v2 }
  0xa4   :  { %v37_v4 = vsub.f32 %v29_v0, %v35_v3 }
  0xa5   :  { %v34_v5 = vpop.xlane.xlu0 %33 }
  0xa6   :  { %v36_v6 = vmul.f32 0.0078125, %v34_v5  ;;  %v39_v7 = vmul.f32 %v37_v4, %v37_v4 }
  0xa8   :  { %v38_v8 = vsub.f32 %v30_v1, %v36_v6  ;;  %41 = vadd.xlane.f32.xlu1 %v39_v7 }
  0xaa   :  { %v40_v9 = vmul.f32 %v38_v8, %v38_v8 }
  0xac   :  { %43 = vadd.xlane.f32.xlu1 %v40_v9 }
 0x135   :  { %v42_v10 = vpop.xlane.xlu1 %41 }
 0x136   :  { %v45_v11 = vmul.f32 0.007874016, %v42_v10 }
 0x138   :  { %110 = vrsqrt.f32 %v45_v11  ;;  %vm49_vm0 = vcmp.eq.f32.partialorder %v45_v11, inf  ;;  %v52_v16 = vand.u32 2147483648, %v45_v11  ;;  %vm51_vm1 = vcmp.eq.f32.partialorder %v45_v11, 0.0 }
 0x139   :  { %v44_v12 = vpop.xlane.xlu1 %43 }
 0x13a   :  { %v46_v13 = vmul.f32 0.007874016, %v44_v12 }
 0x13c   :  { %112 = vrsqrt.f32 %v46_v13  ;;  %vm56_vm2 = vcmp.eq.f32.partialorder %v46_v13, inf  ;;  %v59_v22 = vand.u32 2147483648, %v46_v13  ;;  %vm58_vm3 = vcmp.eq.f32.partialorder %v46_v13, 0.0 }
 0x142   :  { %v111_v14 = vpop.eup %110 }
 0x143   :  { %v48_v15 = vmul.f32 %v111_v14, %v45_v11 }
 0x145   :  { %v50_v17 = vsel %vm49_vm0, %v45_v11, %v48_v15 }
 0x146   :  { %v113_v18 = vpop.eup %112  ;;  %v53_v19 = vsel %vm51_vm1, %v52_v16, %v50_v17 }
 0x147   :  { %v55_v20 = vmul.f32 %v113_v18, %v46_v13  ;;  %v61_v21 = vadd.f32 1e-06, %v53_v19 }
 0x149   :  { %v57_v23 = vsel %vm56_vm2, %v46_v13, %v55_v20  ;;  %114 = vrcp.f32 %v61_v21 }
 0x14a   :  { %v60_v24 = vsel %vm58_vm3, %v59_v22, %v57_v23 }
 0x14b   :  { %v62_v25 = vadd.f32 1e-06, %v60_v24 }
 0x14d   :  { %116 = vrcp.f32 %v62_v25 }
 0x153   :  { %v115_v26 = vpop.eup %114 }
 0x154   :  { %v67_v28 = vmul.f32 %v115_v26, %v37_v4 }
 0x156   :  { %v75_v30 = vmul.f32 %v104_v27, %v67_v28 }
 0x157   :  { %v117_v31 = vpop.eup %116 }
 0x158   :  { %v68_v32 = vmul.f32 %v117_v31, %v38_v8  ;;  %v83_v33 = vadd.f32 %v105_v29, %v75_v30 }
 0x15a   :  { %v76_v34 = vmul.f32 %v104_v27, %v68_v32  ;;  %85 = vst [vmem:[#allocation5] sm:$0xff] %v83_v33 }
 0x15c   :  { %v84_v35 = vadd.f32 %v105_v29, %v76_v34 }
 0x15e   :  { %86 = vst [vmem:[#allocation5 + $0x8] sm:$0xff] %v84_v35 }
 0x15f   :  { %151 = shalt.err (!%p148_p12)
}
 0x160   :  { %s152_s5 = scalar_lea.hbm %s229_s3, 256 }
 0x161   :  { %p153_p13 = scmp.ne.s32.totalorder %s229_s3, %s152_s5  ;;  %p156_p0 = scmp.lt.u32.totalorder %s152_s5, %s229_s3 }
 0x163   :  { %p158_p1 = pnand %p156_p0, %p153_p13 }
 0x165   :  { %161 = shalt.err (!%p158_p1)
}
 0x166   :  { %98 = dma.vmem_to_hbm [thread:$0]  %s93_s30, 256, %s229_s3, [#allocation4], %s167_s22, %s167_s22, %s168_s23  }
 0x167   :  { %164 = dma.done.wait [#allocation4], 256  }
 0x168   :  { %165 = vsyncadd [#allocation4], 4294967040 }
 0x169   :  { %102 = vsyncpa [#allocation3], 1 }
 0x16a   :  { %103 = vsyncpa [#allocation4], 1 }

</bundles_post_ra>
